<compile_context>
chip_gen: v7x
topology: tpu7x:2x2x1
jax: 0.10.0
libtpu: 0.0.40
codegen_flags: <defaults>
</compile_context>

<pallas_src>
import functools
import math

import jax
import jax.numpy as jnp
from jax.experimental import pallas as pl
from jax.experimental.pallas import tpu as pltpu


def realnvp_kernel(
    x_ref,
    win1_ref, bin1_ref, win2_ref, bin2_ref, win3_ref, bin3_ref,
    wout1_ref, bout1_ref, wout2_ref, bout2_ref, wout3_ref, bout3_ref,
    out_ref,
    *, d,
):
    """One batch tile of the RealNVP coupling forward.

    x_ref/out_ref are [TB, 2*d]; weights are f32 [in, out] (pre-transposed),
    biases are f32 [1, out].  All matmuls accumulate in f32; ReLU / sigmoid /
    exp / products are f32 on the VPU/EUP.
    """
    x = x_ref[...]                         # [TB, 2*d] f32
    u1 = x[:, :d]
    u2 = x[:, d:]

    def mlp(h, w1, b1, w2, b2, w3, b3):
        h = jnp.dot(h, w1[...], preferred_element_type=jnp.float32) + b1[...]
        h = jnp.maximum(h, 0.0)
        h = jnp.dot(h, w2[...], preferred_element_type=jnp.float32) + b2[...]
        h = jnp.maximum(h, 0.0)
        z = jnp.dot(h, w3[...], preferred_element_type=jnp.float32) + b3[...]
        # Fused head: static lane slice of the [TB, 2*d] result (2*d fits in
        # one 128-lane tile at these sizes, so this is in-register).
        return z[:, :d], z[:, d:]

    # net-in on u2
    s2, t2 = mlp(u2, win1_ref, bin1_ref, win2_ref, bin2_ref, win3_ref, bin3_ref)
    v1 = u1 * jnp.exp(jax.nn.sigmoid(s2) + t2)

    # net-out on v1
    s1, t1 = mlp(v1, wout1_ref, bout1_ref, wout2_ref, bout2_ref,
                 wout3_ref, bout3_ref)
    v2 = u2 * jnp.exp(jax.nn.sigmoid(s1) + t1)

    # Single lane-dense store of the whole 2*d-wide output slab.
    out_ref[...] = jnp.concatenate([v1, v2], axis=-1).astype(out_ref.dtype)


def realnvp_forward(x, params, *, batch_tile=4096):
    """x: [B, 2*input_size] float32; params: dict from init_params."""
    B, two_d = x.shape
    d = two_d // 2
    hidden = params["win1"].shape[1]

    # Tile selection.  A single full-extent tile is always legal; multi-tile
    # blocks need a sublane-aligned (multiple of 8) row count.  Large batches
    # that would otherwise be one tile are split in two so both v7x
    # TensorCores get work (neutral on the single-TC v5e/v6e).
    if B <= batch_tile:
        if B >= 2048 and B % 16 == 0:
            tb = B // 2
        else:
            tb = B
    else:
        tb = max(8, (batch_tile // 8) * 8)

    n_tiles = pl.cdiv(B, tb)
    b_pad = tb * n_tiles
    # Only pad when the last tile is partial (padded rows compute finite junk
    # from the biases and are sliced off below).
    x_in = x if b_pad == B else jnp.pad(x, ((0, b_pad - B), (0, 0)))

    weight_args = (
        params["win1"], params["bin1"], params["win2"], params["bin2"],
        params["win3"], params["bin3"],
        params["wout1"], params["bout1"], params["wout2"], params["bout2"],
        params["wout3"], params["bout3"],
    )

    data_spec = pl.BlockSpec((tb, two_d), lambda i: (i, 0))
    # Constant index_maps keep all weights/biases VMEM-resident across steps.
    weight_specs = [pl.BlockSpec(a.shape, lambda i: (0, 0)) for a in weight_args]

    cost = pl.CostEstimate(
        flops=2 * 2 * b_pad * (d * hidden + hidden * hidden + hidden * 2 * d),
        transcendentals=4 * b_pad * d,
        bytes_accessed=(4 * b_pad * two_d * 2
                        + sum(int(a.size) * a.dtype.itemsize
                              for a in weight_args)),
    )

    out = pl.pallas_call(
        functools.partial(realnvp_kernel, d=d),
        grid=(n_tiles,),
        in_specs=[data_spec] + weight_specs,
        out_specs=data_spec,
        out_shape=jax.ShapeDtypeStruct((b_pad, two_d), x.dtype),
        compiler_params=pltpu.CompilerParams(
            dimension_semantics=("parallel",),
            # Per-step footprint is tiny (2 data streams x 2 buffers x
            # tb*2d*4 B ~= 2 MiB at tb=4096, plus KiB-scale weights); 32 MiB
            # fits the scoped/physical limits on v5e, v6e and v7x.
            vmem_limit_bytes=32 * 1024 * 1024,
        ),
        cost_estimate=cost,
    )(x_in, *weight_args)

    return out if b_pad == B else out[:B]


def init_params(key, input_size, hidden_size):
    """Deterministic init mimicking nn.Linear default (uniform +-1/sqrt(fan_in)).

    Weights are stored pre-transposed [in_features, out_features]; each MLP's
    final Linear keeps its fused [hidden, 2*input_size] layout (matching the
    PyTorch module) and is split into s/t in-register inside the kernel.
    """
    params = {}
    for prefix in ("in", "out"):
        layer_dims = [(1, input_size, hidden_size),
                      (2, hidden_size, hidden_size),
                      (3, hidden_size, 2 * input_size)]
        for idx, fan_in, fan_out in layer_dims:
            key, kw, kb = jax.random.split(key, 3)
            bound = 1.0 / math.sqrt(fan_in)
            params[f"w{prefix}{idx}"] = jax.random.uniform(
                kw, (fan_in, fan_out), jnp.float32, -bound, bound)
            params[f"b{prefix}{idx}"] = jax.random.uniform(
                kb, (1, fan_out), jnp.float32, -bound, bound)
    return params


def reference_forward(x, params):
    """Pure-JAX f32 reference (same math as the PyTorch module)."""
    d = x.shape[-1] // 2
    u1, u2 = x[:, :d], x[:, d:]

    def mlp(h, p):
        h = jnp.maximum(jnp.dot(h, params[f"w{p}1"],
                                preferred_element_type=jnp.float32)
                        + params[f"b{p}1"], 0.0)
        h = jnp.maximum(jnp.dot(h, params[f"w{p}2"],
                                preferred_element_type=jnp.float32)
                        + params[f"b{p}2"], 0.0)
        z = jnp.dot(h, params[f"w{p}3"],
                    preferred_element_type=jnp.float32) + params[f"b{p}3"]
        return z[:, :d], z[:, d:]

    s2, t2 = mlp(u2, "in")
    v1 = u1 * jnp.exp(jax.nn.sigmoid(s2) + t2)
    s1, t1 = mlp(v1, "out")
    v2 = u2 * jnp.exp(jax.nn.sigmoid(s1) + t1)
    return jnp.concatenate([v1, v2], axis=-1)


if __name__ == "__main__":
    input_size = 16
    hidden_size = 32
    batch = 8

    key = jax.random.PRNGKey(0)
    key, kx = jax.random.split(key)
    x = jax.random.normal(kx, (batch, 2 * input_size), jnp.float32)
    params = init_params(key, input_size, hidden_size)

    out = realnvp_forward(x, params)
    out = jax.block_until_ready(out)

    ref = reference_forward(x, params)
    assert out.shape == (batch, 2 * input_size)
    err = float(jnp.max(jnp.abs(out - ref)))
    assert jnp.allclose(out, ref, atol=1e-3, rtol=1e-3), err
    print("KERNEL_OK")
</pallas_src>

<mosaic_0001>
module attributes {stable_mosaic.version = 11 : i64} {
  func.func @realnvp_kernel(%arg0: i32, %arg1: memref<8x32xf32, #tpu.memory_space<vmem>>, %arg2: memref<16x32xf32, #tpu.memory_space<vmem>>, %arg3: memref<1x32xf32, #tpu.memory_space<vmem>>, %arg4: memref<32x32xf32, #tpu.memory_space<vmem>>, %arg5: memref<1x32xf32, #tpu.memory_space<vmem>>, %arg6: memref<32x32xf32, #tpu.memory_space<vmem>>, %arg7: memref<1x32xf32, #tpu.memory_space<vmem>>, %arg8: memref<16x32xf32, #tpu.memory_space<vmem>>, %arg9: memref<1x32xf32, #tpu.memory_space<vmem>>, %arg10: memref<32x32xf32, #tpu.memory_space<vmem>>, %arg11: memref<1x32xf32, #tpu.memory_space<vmem>>, %arg12: memref<32x32xf32, #tpu.memory_space<vmem>>, %arg13: memref<1x32xf32, #tpu.memory_space<vmem>>, %arg14: memref<8x32xf32, #tpu.memory_space<vmem>>) attributes {dimension_semantics = [#tpu.dimension_semantics<parallel>], iteration_bounds = array<i64: 1>, scalar_prefetch = 0 : i64, scratch_operands = 0 : i64, tpu.core_type = #tpu.core_type<tc>, window_params = [{transform_indices = @transform_0, window_bounds = array<i64: 8, 32>}, {pipeline_mode = #tpu.pipeline_mode<synchronous>, transform_indices = @transform_1, window_bounds = array<i64: 16, 32>}, {pipeline_mode = #tpu.pipeline_mode<synchronous>, transform_indices = @transform_2, window_bounds = array<i64: 1, 32>}, {pipeline_mode = #tpu.pipeline_mode<synchronous>, transform_indices = @transform_3, window_bounds = array<i64: 32, 32>}, {pipeline_mode = #tpu.pipeline_mode<synchronous>, transform_indices = @transform_4, window_bounds = array<i64: 1, 32>}, {pipeline_mode = #tpu.pipeline_mode<synchronous>, transform_indices = @transform_5, window_bounds = array<i64: 32, 32>}, {pipeline_mode = #tpu.pipeline_mode<synchronous>, transform_indices = @transform_6, window_bounds = array<i64: 1, 32>}, {pipeline_mode = #tpu.pipeline_mode<synchronous>, transform_indices = @transform_7, window_bounds = array<i64: 16, 32>}, {pipeline_mode = #tpu.pipeline_mode<synchronous>, transform_indices = @transform_8, window_bounds = array<i64: 1, 32>}, {pipeline_mode = #tpu.pipeline_mode<synchronous>, transform_indices = @transform_9, window_bounds = array<i64: 32, 32>}, {pipeline_mode = #tpu.pipeline_mode<synchronous>, transform_indices = @transform_10, window_bounds = array<i64: 1, 32>}, {pipeline_mode = #tpu.pipeline_mode<synchronous>, transform_indices = @transform_11, window_bounds = array<i64: 32, 32>}, {pipeline_mode = #tpu.pipeline_mode<synchronous>, transform_indices = @transform_12, window_bounds = array<i64: 1, 32>}, {transform_indices = @transform_13, window_bounds = array<i64: 8, 32>}]} {
    %c0 = arith.constant 0 : index
    %c0_0 = arith.constant 0 : index
    %0 = vector.load %arg1[%c0, %c0_0] : memref<8x32xf32, #tpu.memory_space<vmem>>, vector<8x32xf32>
    %1 = vector.extract_strided_slice %0 {offsets = [0, 0], sizes = [8, 16], strides = [1, 1]} : vector<8x32xf32> to vector<8x16xf32>
    %2 = vector.extract_strided_slice %0 {offsets = [0, 16], sizes = [8, 16], strides = [1, 1]} : vector<8x32xf32> to vector<8x16xf32>
    %c0_1 = arith.constant 0 : index
    %c0_2 = arith.constant 0 : index
    %3 = vector.load %arg2[%c0_1, %c0_2] : memref<16x32xf32, #tpu.memory_space<vmem>>, vector<16x32xf32>
    %cst = arith.constant dense<0.000000e+00> : vector<8x32xf32>
    %4 = tpu.matmul %2, %3, %cst {dimension_numbers = #tpu.dot_dimension_numbers<[1], [0], [0], [1], [0, 0, 1, 1], [], []>} : vector<8x16xf32>, vector<16x32xf32>, vector<8x32xf32> -> vector<8x32xf32>
    %c0_3 = arith.constant 0 : index
    %c0_4 = arith.constant 0 : index
    %5 = vector.load %arg3[%c0_3, %c0_4] : memref<1x32xf32, #tpu.memory_space<vmem>>, vector<1x32xf32>
    %6 = vector.broadcast %5 : vector<1x32xf32> to vector<8x32xf32>
    %7 = arith.addf %4, %6 : vector<8x32xf32>
    %cst_5 = arith.constant 0.000000e+00 : f32
    %8 = vector.broadcast %cst_5 : f32 to vector<8x32xf32>
    %9 = arith.maximumf %7, %8 : vector<8x32xf32>
    %c0_6 = arith.constant 0 : index
    %c0_7 = arith.constant 0 : index
    %10 = vector.load %arg4[%c0_6, %c0_7] : memref<32x32xf32, #tpu.memory_space<vmem>>, vector<32x32xf32>
    %cst_8 = arith.constant dense<0.000000e+00> : vector<8x32xf32>
    %11 = tpu.matmul %9, %10, %cst_8 {dimension_numbers = #tpu.dot_dimension_numbers<[1], [0], [0], [1], [0, 0, 1, 1], [], []>} : vector<8x32xf32>, vector<32x32xf32>, vector<8x32xf32> -> vector<8x32xf32>
    %c0_9 = arith.constant 0 : index
    %c0_10 = arith.constant 0 : index
    %12 = vector.load %arg5[%c0_9, %c0_10] : memref<1x32xf32, #tpu.memory_space<vmem>>, vector<1x32xf32>
    %13 = vector.broadcast %12 : vector<1x32xf32> to vector<8x32xf32>
    %14 = arith.addf %11, %13 : vector<8x32xf32>
    %cst_11 = arith.constant 0.000000e+00 : f32
    %15 = vector.broadcast %cst_11 : f32 to vector<8x32xf32>
    %16 = arith.maximumf %14, %15 : vector<8x32xf32>
    %c0_12 = arith.constant 0 : index
    %c0_13 = arith.constant 0 : index
    %17 = vector.load %arg6[%c0_12, %c0_13] : memref<32x32xf32, #tpu.memory_space<vmem>>, vector<32x32xf32>
    %cst_14 = arith.constant dense<0.000000e+00> : vector<8x32xf32>
    %18 = tpu.matmul %16, %17, %cst_14 {dimension_numbers = #tpu.dot_dimension_numbers<[1], [0], [0], [1], [0, 0, 1, 1], [], []>} : vector<8x32xf32>, vector<32x32xf32>, vector<8x32xf32> -> vector<8x32xf32>
    %c0_15 = arith.constant 0 : index
    %c0_16 = arith.constant 0 : index
    %19 = vector.load %arg7[%c0_15, %c0_16] : memref<1x32xf32, #tpu.memory_space<vmem>>, vector<1x32xf32>
    %20 = vector.broadcast %19 : vector<1x32xf32> to vector<8x32xf32>
    %21 = arith.addf %18, %20 : vector<8x32xf32>
    %22 = vector.extract_strided_slice %21 {offsets = [0, 0], sizes = [8, 16], strides = [1, 1]} : vector<8x32xf32> to vector<8x16xf32>
    %23 = vector.extract_strided_slice %21 {offsets = [0, 16], sizes = [8, 16], strides = [1, 1]} : vector<8x32xf32> to vector<8x16xf32>
    %24 = arith.negf %22 : vector<8x16xf32>
    %25 = math.exp %24 : vector<8x16xf32>
    %cst_17 = arith.constant 1.000000e+00 : f32
    %26 = vector.broadcast %cst_17 : f32 to vector<8x16xf32>
    %27 = arith.addf %26, %25 : vector<8x16xf32>
    %28 = arith.divf %26, %27 : vector<8x16xf32>
    %29 = arith.addf %28, %23 : vector<8x16xf32>
    %30 = math.exp %29 : vector<8x16xf32>
    %31 = arith.mulf %1, %30 : vector<8x16xf32>
    %c0_18 = arith.constant 0 : index
    %c0_19 = arith.constant 0 : index
    %32 = vector.load %arg8[%c0_18, %c0_19] : memref<16x32xf32, #tpu.memory_space<vmem>>, vector<16x32xf32>
    %cst_20 = arith.constant dense<0.000000e+00> : vector<8x32xf32>
    %33 = tpu.matmul %31, %32, %cst_20 {dimension_numbers = #tpu.dot_dimension_numbers<[1], [0], [0], [1], [0, 0, 1, 1], [], []>} : vector<8x16xf32>, vector<16x32xf32>, vector<8x32xf32> -> vector<8x32xf32>
    %c0_21 = arith.constant 0 : index
    %c0_22 = arith.constant 0 : index
    %34 = vector.load %arg9[%c0_21, %c0_22] : memref<1x32xf32, #tpu.memory_space<vmem>>, vector<1x32xf32>
    %35 = vector.broadcast %34 : vector<1x32xf32> to vector<8x32xf32>
    %36 = arith.addf %33, %35 : vector<8x32xf32>
    %cst_23 = arith.constant 0.000000e+00 : f32
    %37 = vector.broadcast %cst_23 : f32 to vector<8x32xf32>
    %38 = arith.maximumf %36, %37 : vector<8x32xf32>
    %c0_24 = arith.constant 0 : index
    %c0_25 = arith.constant 0 : index
    %39 = vector.load %arg10[%c0_24, %c0_25] : memref<32x32xf32, #tpu.memory_space<vmem>>, vector<32x32xf32>
    %cst_26 = arith.constant dense<0.000000e+00> : vector<8x32xf32>
    %40 = tpu.matmul %38, %39, %cst_26 {dimension_numbers = #tpu.dot_dimension_numbers<[1], [0], [0], [1], [0, 0, 1, 1], [], []>} : vector<8x32xf32>, vector<32x32xf32>, vector<8x32xf32> -> vector<8x32xf32>
    %c0_27 = arith.constant 0 : index
    %c0_28 = arith.constant 0 : index
    %41 = vector.load %arg11[%c0_27, %c0_28] : memref<1x32xf32, #tpu.memory_space<vmem>>, vector<1x32xf32>
    %42 = vector.broadcast %41 : vector<1x32xf32> to vector<8x32xf32>
    %43 = arith.addf %40, %42 : vector<8x32xf32>
    %cst_29 = arith.constant 0.000000e+00 : f32
    %44 = vector.broadcast %cst_29 : f32 to vector<8x32xf32>
    %45 = arith.maximumf %43, %44 : vector<8x32xf32>
    %c0_30 = arith.constant 0 : index
    %c0_31 = arith.constant 0 : index
    %46 = vector.load %arg12[%c0_30, %c0_31] : memref<32x32xf32, #tpu.memory_space<vmem>>, vector<32x32xf32>
    %cst_32 = arith.constant dense<0.000000e+00> : vector<8x32xf32>
    %47 = tpu.matmul %45, %46, %cst_32 {dimension_numbers = #tpu.dot_dimension_numbers<[1], [0], [0], [1], [0, 0, 1, 1], [], []>} : vector<8x32xf32>, vector<32x32xf32>, vector<8x32xf32> -> vector<8x32xf32>
    %c0_33 = arith.constant 0 : index
    %c0_34 = arith.constant 0 : index
    %48 = vector.load %arg13[%c0_33, %c0_34] : memref<1x32xf32, #tpu.memory_space<vmem>>, vector<1x32xf32>
    %49 = vector.broadcast %48 : vector<1x32xf32> to vector<8x32xf32>
    %50 = arith.addf %47, %49 : vector<8x32xf32>
    %51 = vector.extract_strided_slice %50 {offsets = [0, 0], sizes = [8, 16], strides = [1, 1]} : vector<8x32xf32> to vector<8x16xf32>
    %52 = vector.extract_strided_slice %50 {offsets = [0, 16], sizes = [8, 16], strides = [1, 1]} : vector<8x32xf32> to vector<8x16xf32>
    %53 = arith.negf %51 : vector<8x16xf32>
    %54 = math.exp %53 : vector<8x16xf32>
    %cst_35 = arith.constant 1.000000e+00 : f32
    %55 = vector.broadcast %cst_35 : f32 to vector<8x16xf32>
    %56 = arith.addf %55, %54 : vector<8x16xf32>
    %57 = arith.divf %55, %56 : vector<8x16xf32>
    %58 = arith.addf %57, %52 : vector<8x16xf32>
    %59 = math.exp %58 : vector<8x16xf32>
    %60 = arith.mulf %2, %59 : vector<8x16xf32>
    %61 = tpu.concatenate %31, %60 in 1 : vector<8x16xf32>, vector<8x16xf32> -> vector<8x32xf32>
    %c0_36 = arith.constant 0 : index
    %c0_37 = arith.constant 0 : index
    %62 = vector.load %arg14[%c0_36, %c0_37] : memref<8x32xf32, #tpu.memory_space<vmem>>, vector<8x32xf32>
    tpu.vector_store %arg14[%c0_36, %c0_37], %61 {strides = array<i32>} : memref<8x32xf32, #tpu.memory_space<vmem>>, vector<8x32xf32>,
    return
  }
  func.func @transform_0(%arg0: i32) -> (i32, i32) {
    %c0_i32 = arith.constant 0 : i32
    %c0_i32_0 = arith.constant 0 : i32
    return %arg0, %c0_i32 : i32, i32
  }
  func.func @transform_1(%arg0: i32) -> (i32, i32) {
    %c0_i32 = arith.constant 0 : i32
    %c0_i32_0 = arith.constant 0 : i32
    %c0_i32_1 = arith.constant 0 : i32
    return %c0_i32, %c0_i32_0 : i32, i32
  }
  func.func @transform_2(%arg0: i32) -> (i32, i32) {
    %c0_i32 = arith.constant 0 : i32
    %c0_i32_0 = arith.constant 0 : i32
    %c0_i32_1 = arith.constant 0 : i32
    return %c0_i32, %c0_i32_0 : i32, i32
  }
  func.func @transform_3(%arg0: i32) -> (i32, i32) {
    %c0_i32 = arith.constant 0 : i32
    %c0_i32_0 = arith.constant 0 : i32
    %c0_i32_1 = arith.constant 0 : i32
    return %c0_i32, %c0_i32_0 : i32, i32
  }
  func.func @transform_4(%arg0: i32) -> (i32, i32) {
    %c0_i32 = arith.constant 0 : i32
    %c0_i32_0 = arith.constant 0 : i32
    %c0_i32_1 = arith.constant 0 : i32
    return %c0_i32, %c0_i32_0 : i32, i32
  }
  func.func @transform_5(%arg0: i32) -> (i32, i32) {
    %c0_i32 = arith.constant 0 : i32
    %c0_i32_0 = arith.constant 0 : i32
    %c0_i32_1 = arith.constant 0 : i32
    return %c0_i32, %c0_i32_0 : i32, i32
  }
  func.func @transform_6(%arg0: i32) -> (i32, i32) {
    %c0_i32 = arith.constant 0 : i32
    %c0_i32_0 = arith.constant 0 : i32
    %c0_i32_1 = arith.constant 0 : i32
    return %c0_i32, %c0_i32_0 : i32, i32
  }
  func.func @transform_7(%arg0: i32) -> (i32, i32) {
    %c0_i32 = arith.constant 0 : i32
    %c0_i32_0 = arith.constant 0 : i32
    %c0_i32_1 = arith.constant 0 : i32
    return %c0_i32, %c0_i32_0 : i32, i32
  }
  func.func @transform_8(%arg0: i32) -> (i32, i32) {
    %c0_i32 = arith.constant 0 : i32
    %c0_i32_0 = arith.constant 0 : i32
    %c0_i32_1 = arith.constant 0 : i32
    return %c0_i32, %c0_i32_0 : i32, i32
  }
  func.func @transform_9(%arg0: i32) -> (i32, i32) {
    %c0_i32 = arith.constant 0 : i32
    %c0_i32_0 = arith.constant 0 : i32
    %c0_i32_1 = arith.constant 0 : i32
    return %c0_i32, %c0_i32_0 : i32, i32
  }
  func.func @transform_10(%arg0: i32) -> (i32, i32) {
    %c0_i32 = arith.constant 0 : i32
    %c0_i32_0 = arith.constant 0 : i32
    %c0_i32_1 = arith.constant 0 : i32
    return %c0_i32, %c0_i32_0 : i32, i32
  }
  func.func @transform_11(%arg0: i32) -> (i32, i32) {
    %c0_i32 = arith.constant 0 : i32
    %c0_i32_0 = arith.constant 0 : i32
    %c0_i32_1 = arith.constant 0 : i32
    return %c0_i32, %c0_i32_0 : i32, i32
  }
  func.func @transform_12(%arg0: i32) -> (i32, i32) {
    %c0_i32 = arith.constant 0 : i32
    %c0_i32_0 = arith.constant 0 : i32
    %c0_i32_1 = arith.constant 0 : i32
    return %c0_i32, %c0_i32_0 : i32, i32
  }
  func.func @transform_13(%arg0: i32) -> (i32, i32) {
    %c0_i32 = arith.constant 0 : i32
    %c0_i32_0 = arith.constant 0 : i32
    return %arg0, %c0_i32 : i32, i32
  }
}

</mosaic_0001>

<bundles_post_ra>
// kernel: tpu_custom_call.1
= control target key start
LH: loop header
LB: loop body
LE: loop exit
PB: predicated region body
PF: predicated region fallthrough
CT: control target
= control target key end

     0   :  { %18 = vsyncpa [#allocation3], 0  ;;  %s1347_s0 = inlined_call_operand.hbm [shape: f32[8,32], index: 0, kind: input, shape index: {}]   ;;  %s1348_s1 = inlined_call_operand.hbm [shape: f32[16,32], index: 1, kind: input, shape index: {}]   ;;  %s1349_s2 = inlined_call_operand.vmem [shape: f32[1,32], index: 2, kind: input, shape index: {}]   ;;  %s1350_s3 = inlined_call_operand.hbm [shape: f32[32,32], index: 3, kind: input, shape index: {}]   ;;  %s1351_s4 = inlined_call_operand.vmem [shape: f32[1,32], index: 4, kind: input, shape index: {}]   ;;  %s1352_s5 = inlined_call_operand.hbm [shape: f32[32,32], index: 5, kind: input, shape index: {}]   ;;  %s1353_s6 = inlined_call_operand.hbm [shape: f32[1,32], index: 6, kind: input, shape index: {}]   ;;  %s1354_s7 = inlined_call_operand.hbm [shape: f32[16,32], index: 7, kind: input, shape index: {}]   ;;  %s1355_s8 = inlined_call_operand.hbm [shape: f32[1,32], index: 8, kind: input, shape index: {}]   ;;  %s1356_s9 = inlined_call_operand.vmem [shape: f32[32,32], index: 9, kind: input, shape index: {}]   ;;  %s1357_s10 = inlined_call_operand.vmem [shape: f32[1,32], index: 10, kind: input, shape index: {}]   ;;  %s1358_s11 = inlined_call_operand.hbm [shape: f32[32,32], index: 11, kind: input, shape index: {}]   ;;  %s1359_s12 = inlined_call_operand.vmem [shape: f32[1,32], index: 12, kind: input, shape index: {}]   ;;  %s1360_s13 = inlined_call_operand.hbm [shape: f32[8,32], index: 13, kind: output, shape index: {}]  }
   0x1   :  { %19 = vsyncpa [#allocation6], 0 }
   0x2   :  { %20 = vsyncpa [#allocation9], 0 }
   0x3   :  { %21 = vsyncpa [#allocation12], 0 }
   0x4   :  { %22 = vsyncpa [#allocation15], 0 }
   0x5   :  { %23 = vsyncpa [#allocation4], 0  ;;  %s1076_s25 = smov [#allocation5]   ;;  %s866_s29 = scalar_lea.hbm %s1348_s1, 256 }
   0x6   :  { %s39_s26 = sshll.u32 %s1076_s25, 4  ;;  %p867_p0 = scmp.ne.s32.totalorder %s1348_s1, %s866_s29  ;;  %s40_s26 = int_to_ptr.vmem [resolvable:$true] %s39_s26 }
   0x7   :  { %p870_p1 = scmp.lt.u32.totalorder %s866_s29, %s1348_s1 }
   0x9   :  { %p872_p2 = pnand %p870_p1, %p867_p0 }
   0xb   :  { %875 = shalt.err (!%p872_p2)
}
   0xc   :  { %s876_s17 = scalar_lea.vmem %s40_s26, 256  ;;  %p881_p4 = scmp.lt.s32.totalorder %s40_s26, %s40_s26 }
   0xd   :  { %p877_p3 = scmp.ne.s32.totalorder %s40_s26, %s876_s17  ;;  %p882_p5 = scmp.lt.s32.totalorder %s876_s17, %s876_s17 }
   0xf   :  { %p883_p6 = por %p882_p5, %p881_p4 }
  0x11   :  { %p884_p7 = pnand %p883_p6, %p877_p3 }
  0x13   :  { %887 = shalt.err (!%p884_p7)
}
  0x14   :  { %s1077_s18 = smov 128   ;;  %s1078_s19 = smov 8  }
  0x15   :  { %45 = dma.hbm_to_vmem [thread:$0]  %s1348_s1, 256, %s40_s26, [#allocation6], %s1077_s18, %s1077_s18, %s1078_s19  }
  0x16   :  { %s1079_s22 = smov [#allocation8]   ;;  %s1080_s24 = smov [#allocation11]  }
  0x17   :  { %s67_s23 = sshll.u32 %s1079_s22, 4  ;;  %s89_s25 = sshll.u32 %s1080_s24, 4  ;;  %s68_s23 = int_to_ptr.vmem [resolvable:$true] %s67_s23  ;;  %s90_s25 = int_to_ptr.vmem [resolvable:$true] %s89_s25 }
  0x18   :  { %s888_s29 = scalar_lea.hbm %s1352_s5, 512 }
  0x19   :  { %p889_p8 = scmp.ne.s32.totalorder %s1352_s5, %s888_s29  ;;  %p892_p9 = scmp.lt.u32.totalorder %s888_s29, %s1352_s5 }
  0x1b   :  { %p894_p10 = pnand %p892_p9, %p889_p8 }
  0x1d   :  { %897 = shalt.err (!%p894_p10)
}
  0x1e   :  { %s898_s1 = scalar_lea.vmem %s68_s23, 512  ;;  %p903_p12 = scmp.lt.s32.totalorder %s68_s23, %s68_s23 }
  0x1f   :  { %p899_p11 = scmp.ne.s32.totalorder %s68_s23, %s898_s1  ;;  %p904_p13 = scmp.lt.s32.totalorder %s898_s1, %s898_s1 }
  0x21   :  { %p905_p0 = por %p904_p13, %p903_p12 }
  0x23   :  { %p906_p1 = pnand %p905_p0, %p899_p11 }
  0x25   :  { %909 = shalt.err (!%p906_p1)
}
  0x26   :  { %73 = dma.hbm_to_vmem [thread:$0]  %s1352_s5, 512, %s68_s23, [#allocation9], %s1077_s18, %s1077_s18, %s1078_s19  }
  0x27   :  { %s910_s22 = scalar_lea.hbm %s1354_s7, 256 }
  0x28   :  { %p911_p2 = scmp.ne.s32.totalorder %s1354_s7, %s910_s22  ;;  %p914_p3 = scmp.lt.u32.totalorder %s910_s22, %s1354_s7 }
  0x2a   :  { %p916_p4 = pnand %p914_p3, %p911_p2 }
  0x2c   :  { %919 = shalt.err (!%p916_p4)
}
  0x2d   :  { %s920_s30 = scalar_lea.vmem %s90_s25, 256  ;;  %p925_p6 = scmp.lt.s32.totalorder %s90_s25, %s90_s25 }
  0x2e   :  { %p921_p5 = scmp.ne.s32.totalorder %s90_s25, %s920_s30  ;;  %p926_p7 = scmp.lt.s32.totalorder %s920_s30, %s920_s30 }
  0x30   :  { %p927_p8 = por %p926_p7, %p925_p6 }
  0x32   :  { %p928_p9 = pnand %p927_p8, %p921_p5 }
  0x34   :  { %931 = shalt.err (!%p928_p9)
}
  0x35   :  { %95 = dma.hbm_to_vmem [thread:$0]  %s1354_s7, 256, %s90_s25, [#allocation12], %s1077_s18, %s1077_s18, %s1078_s19  }
  0x36   :  { %s1081_s14 = smov [#allocation2]   ;;  %s1082_s16 = smov [#allocation7]  }
  0x37   :  { %s30_s15 = sshll.u32 %s1081_s14, 4  ;;  %s53_s1 = sshll.u32 %s1082_s16, 4  ;;  %s31_s15 = int_to_ptr.vmem [resolvable:$true] %s30_s15  ;;  %s54_s1 = int_to_ptr.vmem [resolvable:$true] %s53_s1 }
  0x38   :  { %s932_s20 = scalar_lea.hbm %s1347_s0, 128 }
  0x39   :  { %p933_p10 = scmp.ne.s32.totalorder %s1347_s0, %s932_s20  ;;  %p936_p11 = scmp.lt.u32.totalorder %s932_s20, %s1347_s0 }
  0x3b   :  { %p938_p12 = pnand %p936_p11, %p933_p10 }
  0x3d   :  { %941 = shalt.err (!%p938_p12)
}
  0x3e   :  { %s942_s7 = scalar_lea.vmem %s31_s15, 128  ;;  %p947_p0 = scmp.lt.s32.totalorder %s31_s15, %s31_s15 }
  0x3f   :  { %p943_p13 = scmp.ne.s32.totalorder %s31_s15, %s942_s7  ;;  %p948_p1 = scmp.lt.s32.totalorder %s942_s7, %s942_s7 }
  0x41   :  { %p949_p2 = por %p948_p1, %p947_p0 }
  0x43   :  { %p950_p3 = pnand %p949_p2, %p943_p13 }
  0x45   :  { %953 = shalt.err (!%p950_p3)
}
  0x46   :  { %33 = dma.hbm_to_vmem [thread:$0]  %s1347_s0, 128, %s31_s15, [#allocation3]  }
  0x47   :  { %s954_s5 = scalar_lea.hbm %s1350_s3, 512 }
  0x48   :  { %p955_p4 = scmp.ne.s32.totalorder %s1350_s3, %s954_s5  ;;  %p958_p5 = scmp.lt.u32.totalorder %s954_s5, %s1350_s3 }
  0x4a   :  { %p960_p6 = pnand %p958_p5, %p955_p4 }
  0x4c   :  { %963 = shalt.err (!%p960_p6)
}
  0x4d   :  { %s964_s17 = scalar_lea.vmem %s54_s1, 512  ;;  %p969_p8 = scmp.lt.s32.totalorder %s54_s1, %s54_s1 }
  0x4e   :  { %p965_p7 = scmp.ne.s32.totalorder %s54_s1, %s964_s17  ;;  %p970_p9 = scmp.lt.s32.totalorder %s964_s17, %s964_s17 }
  0x50   :  { %p971_p10 = por %p970_p9, %p969_p8 }
  0x52   :  { %p972_p11 = pnand %p971_p10, %p965_p7 }
  0x54   :  { %975 = shalt.err (!%p972_p11)
}
  0x55   :  { %59 = dma.hbm_to_vmem [thread:$0]  %s1350_s3, 512, %s54_s1, [#allocation6], %s1077_s18, %s1077_s18, %s1078_s19  }
  0x56   :  { %s1083_s20 = smov [#allocation10]   ;;  %s1084_s22 = smov [#allocation13]  }
  0x57   :  { %s80_s21 = sshll.u32 %s1083_s20, 4  ;;  %s102_s24 = sshll.u32 %s1084_s22, 4  ;;  %s81_s21 = int_to_ptr.vmem [resolvable:$true] %s80_s21  ;;  %s103_s24 = int_to_ptr.vmem [resolvable:$true] %s102_s24 }
  0x58   :  { %s976_s25 = scalar_lea.hbm %s1353_s6, 16 }
  0x59   :  { %p977_p12 = scmp.ne.s32.totalorder %s1353_s6, %s976_s25  ;;  %p980_p13 = scmp.lt.u32.totalorder %s976_s25, %s1353_s6 }
  0x5b   :  { %p982_p0 = pnand %p980_p13, %p977_p12 }
  0x5d   :  { %985 = shalt.err (!%p982_p0)
}
  0x5e   :  { %s986_s3 = scalar_lea.vmem %s81_s21, 16  ;;  %s990_s1 = scalar_lea.vmem %s81_s21, 32 }
  0x5f   :  { %p987_p1 = scmp.ne.s32.totalorder %s81_s21, %s986_s3  ;;  %p991_p2 = scmp.lt.s32.totalorder %s81_s21, %s81_s21 }
  0x60   :  { %p992_p3 = scmp.lt.s32.totalorder %s990_s1, %s986_s3 }
  0x62   :  { %p993_p4 = por %p992_p3, %p991_p2 }
  0x64   :  { %p994_p5 = pnand %p993_p4, %p987_p1 }
  0x66   :  { %997 = shalt.err (!%p994_p5)
}
  0x67   :  { %83 = dma.hbm_to_vmem [thread:$0]  %s1353_s6, 16, %s81_s21, [#allocation9]  }
  0x68   :  { %s998_s17 = scalar_lea.hbm %s1355_s8, 16 }
  0x69   :  { %p999_p6 = scmp.ne.s32.totalorder %s1355_s8, %s998_s17  ;;  %p1002_p7 = scmp.lt.u32.totalorder %s998_s17, %s1355_s8 }
  0x6b   :  { %p1004_p8 = pnand %p1002_p7, %p999_p6 }
  0x6d   :  { %1007 = shalt.err (!%p1004_p8)
}
  0x6e   :  { %s1008_s27 = scalar_lea.vmem %s103_s24, 16  ;;  %s1012_s7 = scalar_lea.vmem %s103_s24, 32 }
  0x6f   :  { %p1009_p9 = scmp.ne.s32.totalorder %s103_s24, %s1008_s27  ;;  %p1013_p10 = scmp.lt.s32.totalorder %s103_s24, %s103_s24 }
  0x70   :  { %p1014_p11 = scmp.lt.s32.totalorder %s1012_s7, %s1008_s27 }
  0x72   :  { %p1015_p12 = por %p1014_p11, %p1013_p10 }
  0x74   :  { %p1016_p13 = pnand %p1015_p12, %p1009_p9 }
  0x76   :  { %1019 = shalt.err (!%p1016_p13)
}
  0x77   :  { %105 = dma.hbm_to_vmem [thread:$0]  %s1355_s8, 16, %s103_s24, [#allocation12]  }
  0x78   :  { %s1085_s25 = smov [#allocation14]   ;;  %s1020_s5 = scalar_lea.hbm %s1358_s11, 512 }
  0x79   :  { %s115_s28 = sshll.u32 %s1085_s25, 4  ;;  %p1021_p0 = scmp.ne.s32.totalorder %s1358_s11, %s1020_s5  ;;  %s116_s28 = int_to_ptr.vmem [resolvable:$true] %s115_s28 }
  0x7a   :  { %p1024_p1 = scmp.lt.u32.totalorder %s1020_s5, %s1358_s11 }
  0x7c   :  { %p1026_p2 = pnand %p1024_p1, %p1021_p0 }
  0x7e   :  { %1029 = shalt.err (!%p1026_p2)
}
  0x7f   :  { %s1030_s16 = scalar_lea.vmem %s116_s28, 512  ;;  %p1035_p4 = scmp.lt.s32.totalorder %s116_s28, %s116_s28 }
  0x80   :  { %p1031_p3 = scmp.ne.s32.totalorder %s116_s28, %s1030_s16  ;;  %p1036_p5 = scmp.lt.s32.totalorder %s1030_s16, %s1030_s16 }
  0x82   :  { %p1037_p6 = por %p1036_p5, %p1035_p4 }
  0x84   :  { %p1038_p7 = pnand %p1037_p6, %p1031_p3 }
  0x86   :  { %1041 = shalt.err (!%p1038_p7)
}
  0x87   :  { %121 = dma.hbm_to_vmem [thread:$0]  %s1358_s11, 512, %s116_s28, [#allocation15], %s1077_s18, %s1077_s18, %s1078_s19  }
  0x88   :  { %1064 = dma.done.wait [#allocation3], 128  }
  0x89   :  { %1065 = vsyncadd [#allocation3], 4294967168 }
  0x8a   :  { %1066 = dma.done.wait [#allocation6], 768  }
  0x8b   :  { %1067 = vsyncadd [#allocation6], 4294966528 }
  0x8c   :  { %1068 = dma.done.wait [#allocation9], 528  }
  0x8d   :  { %1069 = vsyncadd [#allocation9], 4294966768 }
  0x8e   :  { %1070 = dma.done.wait [#allocation12], 272  }
  0x8f   :  { %1071 = vsyncadd [#allocation12], 4294967024 }
  0x90   :  { %1072 = dma.done.wait [#allocation15], 512  }
  0x91   :  { %1073 = vsyncadd [#allocation15], 4294966784  ;;  %v1086_v0 = vmov 0.0|0.0   ;;  %vm1087_vm0 = vmmov 0   ;;  %v1088_v1 = vmov 0.0   ;;  %v1279_v2 = vld [vmem:[#allocation2] sm:$0xff] }
  0x92   :  { %808 = vmatprep.subr.bf16.mxu0 %v1086_v0  ;;  %754 = vmatprep.mubr.msk.f32.mxu0 %vm1087_vm0, %v1088_v1  ;;  %v149_v3 = vld [vmem:[#allocation5] sm:$0xff]  ;;  %v150_v4 = vld [vmem:[#allocation5 + $0x8] sm:$0xff]  ;;  %s1089_s11 = smov 112   ;;  %v235_v6 = vld [vmem:[#allocation7] sm:$0xff]  ;;  %vm161_vm1 = vcmask 130048   ;;  %vm246_vm2 = vcmask 261120  }
  0x93   :  { %811 = vmatprep.subr.bf16.mxu1 %v1086_v0  ;;  %765 = vmatprep.mubr.msk.f32.mxu1 %vm1087_vm0, %v1088_v1  ;;  %v809_v5 = vpack.c.bf16 %v150_v4, %v149_v3  ;;  %v236_v7 = vld [vmem:[#allocation7 + $0x8] sm:$0xff]  ;;  %v237_v10 = vld [vmem:[#allocation7 + $0x10] sm:$0xff]  ;;  %v238_v11 = vld [vmem:[#allocation7 + $0x18] sm:$0xff]  ;;  %s1091_s28 = smov [#allocation16]  }
  0x94   :  { %159 = vrot.lane.b32.xlu0 %v1279_v2, %s1089_s11  ;;  %v812_v8 = vpack.c.bf16 %v236_v7, %v235_v6  ;;  %v815_v12 = vpack.c.bf16 %v238_v11, %v237_v10  ;;  %v321_v13 = vld [vmem:[#allocation8] sm:$0xff]  ;;  %v322_v14 = vld [vmem:[#allocation8 + $0x8] sm:$0xff]  ;;  %v323_v21 = vld [vmem:[#allocation8 + $0x10] sm:$0xff] }
  0x95   :  { %810 = vmatpush3.bf16.msra.mxu0 %v809_v5  ;;  %v818_v15 = vpack.c.bf16 %v322_v14, %v321_v13  ;;  %v710_v16 = vld [vmem:[%s1349_s2] ss:$0 sm:$0xff]  ;;  %v324_v22 = vld [vmem:[#allocation8 + $0x18] sm:$0xff]  ;;  %v420_v30 = vld [vmem:[#allocation11 + $0x8] sm:$0xff] }
  0x96   :  { %813 = vmatpush3.bf16.msra.mxu1 %v812_v8  ;;  %817 = vmatprep.subr.bf16.mxu0 %v1086_v0  ;;  %v821_v23 = vpack.c.bf16 %v324_v22, %v323_v21  ;;  %v712_v24 = vld [vmem:[%s1351_s4] ss:$0 sm:$0xff]  ;;  %v714_v32 = vld [vmem:[#allocation10] ss:$0 sm:$0xff]  ;;  %v503_v37 = vld [vmem:[%s1356_s9 + $0x8] sm:$0xff] }
  0x97   :  { %814 = vmatprep.subr.bf16.mxu1 %v1086_v0  ;;  %v419_v29 = vld [vmem:[#allocation11] sm:$0xff]  ;;  %v504_v48 = vld [vmem:[%s1356_s9 + $0x10] sm:$0xff]  ;;  %v717_v54 = vld [vmem:[#allocation13] ss:$0 sm:$0xff] }
  0x98   :  { %v824_v31 = vpack.c.bf16 %v420_v30, %v419_v29  ;;  %v502_v36 = vld [vmem:[%s1356_s9] sm:$0xff]  ;;  %v505_v49 = vld [vmem:[%s1356_s9 + $0x18] sm:$0xff]  ;;  %v587_v51 = vld [vmem:[#allocation14] sm:$0xff] }
  0x99   :  { %v827_v38 = vpack.c.bf16 %v503_v37, %v502_v36  ;;  %v830_v50 = vpack.c.bf16 %v505_v49, %v504_v48  ;;  %v588_v52 = vld [vmem:[#allocation14 + $0x8] sm:$0xff]  ;;  %v589_v59 = vld [vmem:[#allocation14 + $0x10] sm:$0xff]  ;;  %v590_v60 = vld [vmem:[#allocation14 + $0x18] sm:$0xff] }
  0x9a   :  { %816 = vmatpush3.bf16.msra.mxu1 %v815_v12  ;;  %v833_v53 = vpack.c.bf16 %v588_v52, %v587_v51  ;;  %v836_v61 = vpack.c.bf16 %v590_v60, %v589_v59  ;;  %v719_v62 = vld [vmem:[%s1357_s10] ss:$0 sm:$0xff]  ;;  %s1090_s10 = smov 16  }
  0x9b   :  { %823 = vmatprep.subr.bf16.mxu1 %v1086_v0 }
 0x106   :  { %v160_v9 = vpop.permute.xlu0 %159 }
 0x107   :  { %755 = vmatmul.mubr.msk.f32.vlgmr.msra.gmra.mrb[0].mxu0 %vm161_vm1, %v160_v9 }
 0x108   :  { %776 = vmatprep.mubr.msk.f32.mxu0 %vm1087_vm0, %v1088_v1  ;;  %819 = vmatpush3.bf16.msra.mxu0 %v818_v15 }
 0x109   :  { %820 = vmatprep.subr.bf16.mxu0 %v1086_v0 }
 0x10c   :  { %822 = vmatpush3.bf16.msra.mxu0 %v821_v23 }
 0x10d   :  { %826 = vmatprep.subr.bf16.mxu0 %v1086_v0 }
 0x1da   :  { %v230_v17 = vpop.f32.mrb[0].mxu0 }
 0x1db   :  { %v231_v18 = vadd.f32 %v710_v16, %v230_v17  ;;  %v756_v19 = vpop.f32.mrb[1].mxu0 }
 0x1dd   :  { %v234_v20 = vmax.f32 %v231_v18, 0.0 }
 0x1df   :  { %766 = vmatmul.mubr.msk.f32.vlgmr.msra.gmra.mrb[0].mxu1 %vm246_vm2, %v234_v20 }
 0x1e0   :  { %783 = vmatprep.mubr.msk.f32.mxu1 %vm1087_vm0, %v1088_v1  ;;  %825 = vmatpush3.bf16.msra.mxu1 %v824_v31 }
 0x1e1   :  { %832 = vmatprep.subr.bf16.mxu1 %v1086_v0 }
 0x2b2   :  { %v316_v25 = vpop.f32.mrb[0].mxu1 }
 0x2b3   :  { %v317_v26 = vadd.f32 %v712_v24, %v316_v25  ;;  %v767_v27 = vpop.f32.mrb[1].mxu1 }
 0x2b5   :  { %v320_v28 = vmax.f32 %v317_v26, 0.0 }
 0x2b7   :  { %777 = vmatmul.mubr.msk.f32.vlgmr.msra.gmra.mrb[2].mxu0 %vm246_vm2, %v320_v28 }
 0x2b8   :  { %794 = vmatprep.mubr.msk.f32.mxu0 %vm1087_vm0, %v1088_v1  ;;  %828 = vmatpush3.bf16.msra.mxu0 %v827_v38 }
 0x2b9   :  { %829 = vmatprep.subr.bf16.mxu0 %v1086_v0 }
 0x2bc   :  { %831 = vmatpush3.bf16.msra.mxu0 %v830_v50 }
 0x38a   :  { %v401_v33 = vpop.f32.mrb[2].mxu0 }
 0x38b   :  { %v402_v34 = vadd.f32 %v714_v32, %v401_v33  ;;  %v778_v35 = vpop.f32.mrb[3].mxu0 }
 0x38d   :  { %412 = vrot.lane.b32.xlu0 %v402_v34, %s1089_s11  ;;  %v716_v39 = vmul.f32 -1.442695, %v402_v34 }
 0x38f   :  { %854 = vpow2.f32 %v716_v39 }
 0x399   :  { %v855_v40 = vpop.eup %854 }
 0x39a   :  { %v408_v41 = vadd.f32 1.0, %v855_v40 }
 0x39c   :  { %856 = vrcp.f32 %v408_v41 }
 0x3a6   :  { %v857_v42 = vpop.eup %856 }
 0x3ff   :  { %v413_v43 = vpop.permute.xlu0 %412 }
 0x400   :  { %v415_v44 = vadd.f32 %v857_v42, %v413_v43 }
 0x402   :  { %v416_v45 = vmul.f32 1.442695, %v415_v44 }
 0x404   :  { %858 = vpow2.f32 %v416_v45 }
 0x40e   :  { %v859_v46 = vpop.eup %858 }
 0x40f   :  { %v418_v47 = vmul.f32 %v859_v46, %v1279_v2 }
 0x411   :  { %784 = vmatmul.mubr.msk.f32.vlgmr.msra.gmra.mrb[2].mxu1 %vm161_vm1, %v418_v47 }
 0x412   :  { %805 = vmatprep.mubr.msk.f32.mxu1 %vm1087_vm0, %v1088_v1  ;;  %834 = vmatpush3.bf16.msra.mxu1 %v833_v53 }
 0x413   :  { %835 = vmatprep.subr.bf16.mxu1 %v1086_v0  ;;  %v721_v0 = vld [vmem:[%s1359_s12] ss:$0 sm:$0xff]  ;;  %s697_s12 = sshll.u32 %s1091_s28, 4  ;;  %s698_s12 = int_to_ptr.vmem [resolvable:$true] %s697_s12 }
 0x414   :  { %s1042_s29 = scalar_lea.vmem %s698_s12, 128  ;;  %p1047_p9 = scmp.lt.s32.totalorder %s698_s12, %s698_s12 }
 0x415   :  { %p1043_p8 = scmp.ne.s32.totalorder %s698_s12, %s1042_s29  ;;  %p1048_p10 = scmp.lt.s32.totalorder %s1042_s29, %s1042_s29 }
 0x416   :  { %837 = vmatpush3.bf16.msra.mxu1 %v836_v61 }
 0x417   :  { %p1049_p11 = por %p1048_p10, %p1047_p9 }
 0x419   :  { %p1050_p12 = pnand %p1049_p11, %p1043_p8 }
 0x4e4   :  { %v497_v55 = vpop.f32.mrb[2].mxu1 }
 0x4e5   :  { %v498_v56 = vadd.f32 %v717_v54, %v497_v55  ;;  %v785_v57 = vpop.f32.mrb[3].mxu1 }
 0x4e7   :  { %v501_v58 = vmax.f32 %v498_v56, 0.0 }
 0x4e9   :  { %795 = vmatmul.mubr.msk.f32.vlgmr.msra.gmra.mrb[4].mxu0 %vm246_vm2, %v501_v58 }
 0x5bc   :  { %v582_v63 = vpop.f32.mrb[4].mxu0 }
 0x5bd   :  { %v583_v1 = vadd.f32 %v719_v62, %v582_v63  ;;  %v796_v3 = vpop.f32.mrb[5].mxu0 }
 0x5bf   :  { %v586_v4 = vmax.f32 %v583_v1, 0.0 }
 0x5c1   :  { %806 = vmatmul.mubr.msk.f32.vlgmr.msra.gmra.mrb[4].mxu1 %vm246_vm2, %v586_v4 }
 0x694   :  { %v667_v5 = vpop.f32.mrb[4].mxu1 }
 0x695   :  { %v668_v6 = vadd.f32 %v721_v0, %v667_v5  ;;  %v807_v7 = vpop.f32.mrb[5].mxu1 }
 0x697   :  { %678 = vrot.lane.b32.xlu1 %v668_v6, %s1089_s11  ;;  %v723_v8 = vmul.f32 -1.442695, %v668_v6 }
 0x699   :  { %860 = vpow2.f32 %v723_v8 }
 0x6a3   :  { %v861_v9 = vpop.eup %860 }
 0x6a4   :  { %v674_v10 = vadd.f32 1.0, %v861_v9 }
 0x6a6   :  { %862 = vrcp.f32 %v674_v10 }
 0x6b0   :  { %v863_v11 = vpop.eup %862 }
 0x709   :  { %v679_v12 = vpop.permute.xlu1 %678 }
 0x70a   :  { %v681_v13 = vadd.f32 %v863_v11, %v679_v12 }
 0x70c   :  { %v682_v14 = vmul.f32 1.442695, %v681_v13 }
 0x70e   :  { %864 = vpow2.f32 %v682_v14 }
 0x718   :  { %v865_v15 = vpop.eup %864 }
 0x719   :  { %685 = vrot.lane.b32.xlu1 %v865_v15, %s1090_s10 }
 0x78b   :  { %v686_v16 = vpop.permute.xlu1 %685 }
 0x78c   :  { %v688_v17 = vmul.f32 %v686_v16, %v1279_v2 }
 0x78e   :  { %v689_v18 = vsel %vm161_vm1, %v418_v47, %v688_v17 }
 0x78f   :  { %690 = vst.msk [vmem:[#allocation16] sm:$0xff] %vm246_vm2, %v689_v18 }
 0x790   :  { %1053 = shalt.err (!%p1050_p12)
}
 0x791   :  { %s1054_s3 = scalar_lea.hbm %s1360_s13, 128 }
 0x792   :  { %p1055_p13 = scmp.ne.s32.totalorder %s1360_s13, %s1054_s3  ;;  %p1058_p0 = scmp.lt.u32.totalorder %s1054_s3, %s1360_s13 }
 0x794   :  { %p1060_p1 = pnand %p1058_p0, %p1055_p13 }
 0x796   :  { %1063 = shalt.err (!%p1060_p1)
}
 0x797   :  { %700 = dma.vmem_to_hbm [thread:$0]  %s698_s12, 128, %s1360_s13, [#allocation4]  }
 0x798   :  { %1074 = dma.done.wait [#allocation4], 128  }
 0x799   :  { %1075 = vsyncadd [#allocation4], 4294967168 }
 0x79a   :  { %704 = vsyncpa [#allocation3], 1 }
 0x79b   :  { %705 = vsyncpa [#allocation6], 1 }
 0x79c   :  { %706 = vsyncpa [#allocation9], 1 }
 0x79d   :  { %707 = vsyncpa [#allocation12], 1 }
 0x79e   :  { %708 = vsyncpa [#allocation15], 1 }
 0x79f   :  { %709 = vsyncpa [#allocation4], 1 }

</bundles_post_ra>
